<compile_context>
chip_gen: v5e
topology: v5e:2x2
jax: 0.10.0
libtpu: 0.0.40
codegen_flags: <defaults>
</compile_context>

<pallas_src>
import jax
import jax.numpy as jnp
from jax.experimental import pallas as pl
from jax.experimental.pallas import tpu as pltpu


# --------------------------------------------------------------------------- #
# Kernel
# --------------------------------------------------------------------------- #
def _attention_kernel(len_ref, h_ref, m_ref, ctx_ref, attn_ref):
    """One batch tile.

    len_ref : (TB, 1, 1) int32 -- valid lengths for this batch tile
    h_ref   : (TB, 1, D)       -- decoder hidden state tile (native dtype)
    m_ref   : (TB, S, D)       -- encoder memory tile (native dtype)
    ctx_ref : (TB, 1, D) f32   -- output context tile
    attn_ref: (TB, 1, S) f32   -- output attention weights tile
    """
    tb, _, seq = attn_ref.shape

    h = h_ref[...]                       # (TB, 1, D) native dtype
    m = m_ref[...]                       # (TB, S, D) native dtype

    # scores[b, 0, s] = <hidden[b], memory[b, s]>  -- batched (1,D)x(D,S) matmuls
    # on the (otherwise idle) MXU, accumulated in f32.
    s = jnp.einsum('bqd,bkd->bqk', h, m,
                   preferred_element_type=jnp.float32)      # (TB, 1, S) f32

    # Mask positions s >= length[b] with a large *finite* negative: masked slots
    # underflow to exactly 0 after exp (matching masked_fill(-inf) + softmax),
    # while fully-masked rows give a uniform distribution instead of NaN.
    lens = len_ref[...]                                       # (TB, 1, 1) int32
    pos = jax.lax.broadcasted_iota(jnp.int32, (tb, 1, seq), 2)
    s = jnp.where(pos >= lens, jnp.float32(-1e30), s)

    # Numerically stable softmax over the sequence axis (exact normalization).
    s_max = jnp.max(s, axis=2, keepdims=True)
    e = jnp.exp(s - s_max)
    denom = jnp.sum(e, axis=2, keepdims=True)
    probs = e / denom                                         # (TB, 1, S) f32

    attn_ref[...] = probs.astype(attn_ref.dtype)

    # context[b, 0, d] = sum_s probs[b, 0, s] * memory[b, s, d]
    # Batched (1,S)x(S,D) matmul on the MXU; probs cast to memory dtype for the
    # MXU inputs, accumulate in f32 (same pattern as flash attention's PV matmul).
    ctx = jnp.einsum('bqk,bkd->bqd', probs.astype(m.dtype), m,
                     preferred_element_type=jnp.float32)      # (TB, 1, D)
    ctx_ref[...] = ctx.astype(ctx_ref.dtype)


# --------------------------------------------------------------------------- #
# Generation-aware tiling helpers
# --------------------------------------------------------------------------- #
def _vmem_capacity_bytes():
    try:
        info = pltpu.get_tpu_info()
        cap = getattr(info, "vmem_capacity_bytes", None)
        if cap:
            return int(cap)
    except Exception:
        pass
    return 64 << 20  # conservative default: smallest per-core VMEM (v7x)


def _choose_block_b(B, S, D, itemsize):
    """Pick the batch-tile size from the VMEM budget of the current generation."""
    vmem_cap = _vmem_capacity_bytes()
    budget = vmem_cap // 2                       # headroom for Mosaic scratch/temps
    row_mem = S * D * itemsize                   # one batch row of `memory`
    # Per-step VMEM: double-buffered memory tile + hidden/ctx tiles + f32
    # scores/exp/probs temporaries + attn output tile.
    per_row = 2 * row_mem + 2 * D * (itemsize + 4) + 12 * S * 4 + 64
    tb = max(1, min(B, budget // max(per_row, 1)))
    # ~4 MiB memory slab per grid step amortizes the ~0.35 us pipeline overhead.
    tb = min(tb, max(1, (4 << 20) // max(row_mem, 1)))
    # Keep the grid >= 4 steps when the batch allows it: on v7x the "parallel"
    # batch axis shards across 2 TensorCores and each core still wants >= 2
    # steps to overlap DMA with compute.
    if B >= 4 and B // tb < 4:
        tb = max(1, B // 4)
    return tb


def _vmem_limit_bytes():
    vmem_cap = _vmem_capacity_bytes()
    # ~96-100 MiB on 128 MiB parts (v5e/v6e), ~56 MiB on the 64 MiB v7x.
    return min(100 << 20, int(vmem_cap * 0.88))


# --------------------------------------------------------------------------- #
# Wrapper
# --------------------------------------------------------------------------- #
def bahdanau_attention(hidden, memory, memory_length=None, *, block_b=None):
    """hidden: (B, D), memory: (B, S, D), memory_length: optional (B,) ints.

    Returns (context (B, D) f32, attn (B, S) f32).

    Divergence note: rows with length == 0 return uniform attention weights and
    context = mean(memory) instead of the NaNs the PyTorch -inf softmax produces.
    """
    B, S, D = memory.shape
    assert hidden.shape == (B, D)

    if memory_length is None:
        lens = jnp.full((B,), S, dtype=jnp.int32)
    else:
        lens = jnp.asarray(memory_length, dtype=jnp.int32).reshape(B)

    itemsize = jnp.dtype(memory.dtype).itemsize
    tb = block_b if block_b is not None else _choose_block_b(B, S, D, itemsize)
    tb = max(1, min(int(tb), B))

    # Pad the batch to a multiple of the tile (padded rows discarded afterwards).
    Bp = ((B + tb - 1) // tb) * tb
    if Bp != B:
        pad = Bp - B
        hidden = jnp.pad(hidden, ((0, pad), (0, 0)))
        memory = jnp.pad(memory, ((0, pad), (0, 0), (0, 0)))
        lens = jnp.pad(lens, ((0, pad),), constant_values=S)

    hidden3 = hidden.reshape(Bp, 1, D)       # q=1 axis -> flash-style batched matmuls
    lens3 = lens.reshape(Bp, 1, 1)
    grid = (Bp // tb,)

    # TODO(synk): for very long S where one (tb, S, D) slab no longer fits VMEM,
    # add an S-tiled "arbitrary" trailing grid axis with online-softmax scratch.
    ctx3, attn3 = pl.pallas_call(
        _attention_kernel,
        out_shape=(
            jax.ShapeDtypeStruct((Bp, 1, D), jnp.float32),
            jax.ShapeDtypeStruct((Bp, 1, S), jnp.float32),
        ),
        grid_spec=pltpu.PrefetchScalarGridSpec(
            num_scalar_prefetch=0,
            grid=grid,
            in_specs=[
                pl.BlockSpec((tb, 1, 1), lambda i: (i, 0, 0)),   # lengths
                pl.BlockSpec((tb, 1, D), lambda i: (i, 0, 0)),   # hidden
                pl.BlockSpec((tb, S, D), lambda i: (i, 0, 0)),   # memory
            ],
            out_specs=(
                pl.BlockSpec((tb, 1, D), lambda i: (i, 0, 0)),   # context
                pl.BlockSpec((tb, 1, S), lambda i: (i, 0, 0)),   # attention
            ),
        ),
        compiler_params=pltpu.CompilerParams(
            dimension_semantics=("parallel",),       # batch rows are independent
            vmem_limit_bytes=_vmem_limit_bytes(),
        ),
        cost_estimate=pl.CostEstimate(
            flops=4 * Bp * S * D,
            transcendentals=Bp * S,
            bytes_accessed=(Bp * S * D * itemsize + Bp * D * itemsize
                            + Bp * D * 4 + Bp * S * 4 + Bp * 4),
        ),
    )(lens3, hidden3, memory)

    ctx = ctx3.reshape(Bp, D)[:B]
    attn = attn3.reshape(Bp, S)[:B]
    return ctx, attn


# --------------------------------------------------------------------------- #
# Pure-JAX reference mirroring the PyTorch forward
# --------------------------------------------------------------------------- #
def _reference(hidden, memory, memory_length=None):
    B, S, D = memory.shape
    h = hidden.astype(jnp.float32)
    m = memory.astype(jnp.float32)
    scores = jnp.einsum('bd,bsd->bs', h, m)
    if memory_length is not None:
        lens = jnp.asarray(memory_length, dtype=jnp.int32).reshape(B, 1)
        pos = jnp.arange(S, dtype=jnp.int32)[None, :]
        scores = jnp.where(pos >= lens, -jnp.inf, scores)
    probs = jax.nn.softmax(scores, axis=1)
    ctx = jnp.einsum('bs,bsd->bd', probs, m)
    return ctx, probs


if __name__ == "__main__":
    key = jax.random.PRNGKey(0)

    # --- Test 1: lane/sublane-friendly shapes, multi-step batch-parallel grid. ---
    B, S, D = 16, 128, 128
    k1, k2, k3 = jax.random.split(key, 3)
    hidden = jax.random.normal(k1, (B, D), dtype=jnp.float32)
    memory = jax.random.normal(k2, (B, S, D), dtype=jnp.float32)
    memory_length = jax.random.randint(k3, (B,), 1, S + 1)

    ctx, attn = bahdanau_attention(hidden, memory, memory_length)
    jax.block_until_ready((ctx, attn))
    ctx_ref, attn_ref = _reference(hidden, memory, memory_length)
    assert ctx.shape == (B, D) and attn.shape == (B, S)
    assert jnp.allclose(ctx, ctx_ref, atol=2e-3, rtol=2e-3), "ctx mismatch (test 1)"
    assert jnp.allclose(attn, attn_ref, atol=2e-3, rtol=2e-3), "attn mismatch (test 1)"

    # --- Test 2: tiny module-like shapes (B=2, S=8, D=32) + exact masking check. ---
    B2, S2, D2 = 2, 8, 32
    k4, k5 = jax.random.split(k3)
    hidden2 = jax.random.normal(k4, (B2, D2), dtype=jnp.float32)
    memory2 = jax.random.normal(k5, (B2, S2, D2), dtype=jnp.float32)
    lens2 = [5, 8]
    ctx2, attn2 = bahdanau_attention(hidden2, memory2, lens2)
    jax.block_until_ready((ctx2, attn2))
    ctx2_ref, attn2_ref = _reference(hidden2, memory2, lens2)
    assert jnp.allclose(ctx2, ctx2_ref, atol=2e-3, rtol=2e-3), "ctx mismatch (test 2)"
    assert jnp.allclose(attn2, attn2_ref, atol=2e-3, rtol=2e-3), "attn mismatch (test 2)"
    # masked positions must carry exactly zero attention weight
    assert float(jnp.sum(attn2[0, 5:])) == 0.0, "masked weights must be exactly zero"

    # --- Test 3: no mask + batch not divisible by the tile (padding path). ---
    B3, S3, D3 = 6, 16, 32
    k6, k7 = jax.random.split(k5)
    hidden_c = jax.random.normal(k6, (B3, D3), dtype=jnp.float32)
    memory_c = jax.random.normal(k7, (B3, S3, D3), dtype=jnp.float32)
    ctx_c, attn_c = bahdanau_attention(hidden_c, memory_c, block_b=4)
    jax.block_until_ready((ctx_c, attn_c))
    ctx_c_ref, attn_c_ref = _reference(hidden_c, memory_c)
    assert jnp.allclose(ctx_c, ctx_c_ref, atol=2e-3, rtol=2e-3), "ctx mismatch (test 3)"
    assert jnp.allclose(attn_c, attn_c_ref, atol=2e-3, rtol=2e-3), "attn mismatch (test 3)"

    print("KERNEL_OK")
</pallas_src>

<mosaic_0001>
module attributes {stable_mosaic.version = 11 : i64} {
  func.func @_attention_kernel(%arg0: i32, %arg1: memref<4x1x1xi32, #tpu.memory_space<vmem>>, %arg2: memref<4x1x128xf32, #tpu.memory_space<vmem>>, %arg3: memref<4x128x128xf32, #tpu.memory_space<vmem>>, %arg4: memref<4x1x128xf32, #tpu.memory_space<vmem>>, %arg5: memref<4x1x128xf32, #tpu.memory_space<vmem>>) attributes {dimension_semantics = [#tpu.dimension_semantics<parallel>], iteration_bounds = array<i64: 4>, scalar_prefetch = 0 : i64, scratch_operands = 0 : i64, tpu.core_type = #tpu.core_type<tc>, window_params = [{transform_indices = @transform_0, window_bounds = array<i64: 4, 1, 1>}, {transform_indices = @transform_1, window_bounds = array<i64: 4, 1, 128>}, {transform_indices = @transform_2, window_bounds = array<i64: 4, 128, 128>}, {transform_indices = @transform_3, window_bounds = array<i64: 4, 1, 128>}, {transform_indices = @transform_4, window_bounds = array<i64: 4, 1, 128>}]} {
    %c0 = arith.constant 0 : index
    %c0_0 = arith.constant 0 : index
    %c0_1 = arith.constant 0 : index
    %0 = vector.load %arg2[%c0, %c0_0, %c0_1] : memref<4x1x128xf32, #tpu.memory_space<vmem>>, vector<4x1x128xf32>
    %c0_2 = arith.constant 0 : index
    %c0_3 = arith.constant 0 : index
    %c0_4 = arith.constant 0 : index
    %1 = vector.load %arg3[%c0_2, %c0_3, %c0_4] : memref<4x128x128xf32, #tpu.memory_space<vmem>>, vector<4x128x128xf32>
    "tpu.trace_start"() <{level = 10 : i32, message = "bqd,bkd->bqk"}> : () -> ()
    %cst = arith.constant dense<0.000000e+00> : vector<4x1x128xf32>
    %2 = tpu.matmul %0, %1, %cst {dimension_numbers = #tpu.dot_dimension_numbers<[2], [2], [1], [1], [0, 0, 0, 1, 1, 1], [0], [0]>} : vector<4x1x128xf32>, vector<4x128x128xf32>, vector<4x1x128xf32> -> vector<4x1x128xf32>
    "tpu.trace_stop"() : () -> ()
    %c0_5 = arith.constant 0 : index
    %c0_6 = arith.constant 0 : index
    %c0_7 = arith.constant 0 : index
    %3 = vector.load %arg1[%c0_5, %c0_6, %c0_7] : memref<4x1x1xi32, #tpu.memory_space<vmem>>, vector<4x1x1xi32>
    %4 = tpu.iota {dimensions = array<i32: 2>} : vector<4x1x128xi32>
    %5 = vector.broadcast %3 : vector<4x1x1xi32> to vector<4x1x128xi32>
    %6 = arith.cmpi sge, %4, %5 : vector<4x1x128xi32>
    %cst_8 = arith.constant -1.000000e+30 : f32
    %7 = vector.broadcast %cst_8 : f32 to vector<4x1x128xf32>
    %8 = arith.select %6, %7, %2 : vector<4x1x128xi1>, vector<4x1x128xf32>
    %cst_9 = arith.constant dense<0xFF800000> : vector<4x1xf32>
    %9 = vector.multi_reduction <maximumf>, %8, %cst_9 [2] : vector<4x1x128xf32> to vector<4x1xf32>
    %10 = vector.shape_cast %9 : vector<4x1xf32> to vector<4x1x1xf32>
    %11 = vector.broadcast %10 : vector<4x1x1xf32> to vector<4x1x128xf32>
    %12 = arith.subf %8, %11 : vector<4x1x128xf32>
    %13 = math.exp %12 : vector<4x1x128xf32>
    %cst_10 = arith.constant dense<0.000000e+00> : vector<4x1xf32>
    %14 = vector.multi_reduction <add>, %13, %cst_10 [2] : vector<4x1x128xf32> to vector<4x1xf32>
    %15 = vector.shape_cast %14 : vector<4x1xf32> to vector<4x1x1xf32>
    %16 = vector.broadcast %15 : vector<4x1x1xf32> to vector<4x1x128xf32>
    %17 = arith.divf %13, %16 : vector<4x1x128xf32>
    %c0_11 = arith.constant 0 : index
    %c0_12 = arith.constant 0 : index
    %c0_13 = arith.constant 0 : index
    %18 = vector.load %arg5[%c0_11, %c0_12, %c0_13] : memref<4x1x128xf32, #tpu.memory_space<vmem>>, vector<4x1x128xf32>
    tpu.vector_store %arg5[%c0_11, %c0_12, %c0_13], %17 {strides = array<i32>} : memref<4x1x128xf32, #tpu.memory_space<vmem>>, vector<4x1x128xf32>,
    "tpu.trace_start"() <{level = 10 : i32, message = "bqk,bkd->bqd"}> : () -> ()
    %cst_14 = arith.constant dense<0.000000e+00> : vector<4x1x128xf32>
    %19 = tpu.matmul %17, %1, %cst_14 {dimension_numbers = #tpu.dot_dimension_numbers<[2], [1], [1], [2], [0, 0, 0, 1, 1, 2], [0], [0]>} : vector<4x1x128xf32>, vector<4x128x128xf32>, vector<4x1x128xf32> -> vector<4x1x128xf32>
    "tpu.trace_stop"() : () -> ()
    %c0_15 = arith.constant 0 : index
    %c0_16 = arith.constant 0 : index
    %c0_17 = arith.constant 0 : index
    %20 = vector.load %arg4[%c0_15, %c0_16, %c0_17] : memref<4x1x128xf32, #tpu.memory_space<vmem>>, vector<4x1x128xf32>
    tpu.vector_store %arg4[%c0_15, %c0_16, %c0_17], %19 {strides = array<i32>} : memref<4x1x128xf32, #tpu.memory_space<vmem>>, vector<4x1x128xf32>,
    return
  }
  func.func @transform_0(%arg0: i32) -> (i32, i32, i32) {
    %c0_i32 = arith.constant 0 : i32
    %c0_i32_0 = arith.constant 0 : i32
    %c0_i32_1 = arith.constant 0 : i32
    return %arg0, %c0_i32, %c0_i32_0 : i32, i32, i32
  }
  func.func @transform_1(%arg0: i32) -> (i32, i32, i32) {
    %c0_i32 = arith.constant 0 : i32
    %c0_i32_0 = arith.constant 0 : i32
    %c0_i32_1 = arith.constant 0 : i32
    return %arg0, %c0_i32, %c0_i32_0 : i32, i32, i32
  }
  func.func @transform_2(%arg0: i32) -> (i32, i32, i32) {
    %c0_i32 = arith.constant 0 : i32
    %c0_i32_0 = arith.constant 0 : i32
    %c0_i32_1 = arith.constant 0 : i32
    return %arg0, %c0_i32, %c0_i32_0 : i32, i32, i32
  }
  func.func @transform_3(%arg0: i32) -> (i32, i32, i32) {
    %c0_i32 = arith.constant 0 : i32
    %c0_i32_0 = arith.constant 0 : i32
    %c0_i32_1 = arith.constant 0 : i32
    return %arg0, %c0_i32, %c0_i32_0 : i32, i32, i32
  }
  func.func @transform_4(%arg0: i32) -> (i32, i32, i32) {
    %c0_i32 = arith.constant 0 : i32
    %c0_i32_0 = arith.constant 0 : i32
    %c0_i32_1 = arith.constant 0 : i32
    return %arg0, %c0_i32, %c0_i32_0 : i32, i32, i32
  }
}

</mosaic_0001>

<bundles_post_ra>
// kernel: tpu_custom_call.1
= control target key start
LH: loop header
LB: loop body
LE: loop exit
PB: predicated region body
PF: predicated region fallthrough
CT: control target
= control target key end

     0   :  { %10 = vsyncpa [#allocation3], 0  ;;  %s1569_s0 = inlined_call_operand.vmem [shape: s32[16,1,1], index: 0, kind: input, shape index: {}]   ;;  %s1570_s1 = inlined_call_operand.vmem [shape: f32[16,1,128], index: 1, kind: input, shape index: {}]   ;;  %s1571_s2 = inlined_call_operand.hbm [shape: f32[16,128,128], index: 2, kind: input, shape index: {}]   ;;  %s1572_s3 = inlined_call_operand.hbm [shape: f32[16,1,128], index: 3, kind: output, shape index: {0}]   ;;  %s1573_s4 = inlined_call_operand.hbm [shape: f32[16,1,128], index: 4, kind: output, shape index: {1}]  }
   0x1   :  { %12 = vsyncpa [#allocation3 + $0x1], 0 }
   0x2   :  { %13 = vsyncpa [#allocation4], 0 }
   0x3   :  { %15 = vsyncpa [#allocation4 + $0x1], 0 }
   0x4   :  { %16 = vsyncpa [#allocation7], 0 }
   0x5   :  { %18 = vsyncpa [#allocation7 + $0x1], 0  ;;  %s1049_s15 = smov 0   ;;  %s1051_s16 = smov 0  }
   0x6   :  { %s1053_s17 = smov 0   ;;  %s1055_s18 = smov 0  }
   0x7 LB: > { %s1070_s19 = sadd.s32 4294967295, %s1017_s18   ;;  %s794_s20 = sadd.s32 4294967294, %s1017_s18   ;;  %s1017_s18 = sphi %s1055_s18, %s1594_s18   ;;  %s1013_s17 = sphi %s1053_s17, %s1593_s17   ;;  %s1009_s16 = sphi %s1051_s16, %s1592_s16   ;;  %s1005_s15 = sphi %s1049_s15, %s1591_s15  }
   0x8   : > { %s1074_s21 = sadd.s32 1, %s1017_s18   ;;  %s83_s22 = sadd.s32 1, %s1013_s17 }
   0x9   : > { %s80_s23 = ssub.s32 %s1017_s18, %s1074_s21  ;;  %p90_p0 = scmp.ne.s32.totalorder %s1013_s17, %s1009_s16 }
   0xa   : > { %p81_p1 = scmp.eq.s32.totalorder %s80_s23, 0  ;;  %p91_p2 = scmp.eq.s32.totalorder %s1017_s18, 0 }
   0xb   : > { %p96_p3 = scmp.ne.s32.totalorder %s1009_s16, %s1005_s15  ;;  %p97_p4 = scmp.eq.s32.totalorder %s1070_s19, 0 }
   0xc   : > { %s1086_s24 = scalar_select %p81_p1, %s1013_s17, %s83_s22  }
   0xd   : > { %p1088_p5 = por %p91_p2, %p90_p0  ;;  %p1092_p6 = por %p97_p4, %p96_p3 }
   0xe   : > { %p120_p7 = scmp.eq.s32.totalorder %s1070_s19, 3  ;;  %p126_p8 = scmp.eq.s32.totalorder %s794_s20, 3 }
   0xf   : > { %p832_p9 = scmp.lt.s32.totalorder %s1017_s18, 4  ;;  %s188_s29 = sand.u32 1, %s1013_s17  }
  0x10   : > { %p1098_p10 = por %p120_p7, %p90_p0  ;;  %p1102_p11 = por %p126_p8, %p96_p3 }
  0x11   : > { %s814_s30 = sshll.u32 %s1017_s18, 9  ;;  %s797_s5 = sshll.u32 %s188_s29, 9 }
  0x12   : > { %s198_s8 = scalar_lea.hbm %s1571_s2, %s814_s30  ;;  %s192_s10 = scalar_lea.vmem [#allocation2], %s797_s5 }
  0x13   : > { %s199_s9 = sshll.u32 %s198_s8, 4  ;;  %s201_s11 = sshll.u32 %s192_s10, 4  ;;  %s200_s9 = int_to_ptr.hbm [resolvable:$true] %s199_s9  ;;  %s202_s11 = int_to_ptr.vmem [resolvable:$true] %s201_s11 }
  0x14   : > { %p1113_p12 = pnand %p832_p9, %p1088_p5  ;;  %p801_p13 = scmp.ge.s32.totalorder %s1017_s18, 1 }
  0x15   : > { %p209_p0 = scmp.lt.s32.totalorder %s1017_s18, 5  ;;  %s189_s13 = scalar_lea.sflag [#allocation3], %s188_s29 }
  0x16   : > { %s889_s14 = sshra.s32 %s200_s9, 4  ;;  %p893_p2 = pneg %p1113_p12  ;;  %s890_s14 = int_to_ptr.hbm [resolvable:$true] %s889_s14 }
  0x17   : > { %s891_s20 = scalar_lea.hbm %s890_s14, 512  ;;  %s896_s25 = scalar_lea.hbm %s1571_s2, 2048 }
  0x18   : > { %p892_p1 = scmp.ne.s32.totalorder %s890_s14, %s891_s20  ;;  %p897_p5 = scmp.lt.s32.totalorder %s890_s14, %s1571_s2 }
  0x19   : > { %p898_p7 = scmp.lt.s32.totalorder %s896_s25, %s891_s20 }
  0x1a   : > { %p894_p3 = pnand %p893_p2, %p892_p1 }
  0x1b   : > { %p899_p8 = por %p898_p7, %p897_p5 }
  0x1c   : > { %p895_p4 = pneg %p894_p3 }
  0x1e   : > { %p900_p9 = pnand %p899_p8, %p895_p4 }
  0x20   : > { %903 = shalt.err (!%p900_p9)
}
  0x21   : > { %s1019_s29 = smov 128   ;;  %s1020_s6 = smov 8  }
  0x22   : > { %824 = dma.hbm_to_vmem [thread:$0]  (!%p1113_p12), %s200_s9, 8192, %s202_s11, %s189_s13, %s1019_s29, %s1019_s29, %s1020_s6  }
  0x23   : > { %p210_p1 = pnand %p801_p13, %p209_p0 }
  0x25   : > { %213 = sbr.rel (%p210_p1) target bundleno = 654 (0x28e), region = 32 }
  0x2a   : > { %s1134_s7 = sand.u32 1, %s1009_s16  }
  0x2b   : > { %s802_s8 = sshll.u32 %s1134_s7, 9  ;;  %s216_s10 = scalar_lea.sflag [#allocation3], %s1134_s7 }
  0x2c   : > { %s1138_s14 = scalar_lea.vmem [#allocation2], %s802_s8 }
  0x2d   : > { %992 = dma.done.wait (%p1092_p6), %s216_s10, 8192  }
  0x2e   : > { %994 = vsyncadd (%p1092_p6), %s216_s10, 4294959104  ;;  %v1145_v0 = vld [vmem:[%s1138_s14 + $0x78] sm:$0xff]  ;;  %v1161_v4 = vld [vmem:[%s1138_s14 + $0x70] sm:$0xff]  ;;  %s1221_s26 = sshll.u32 %s1070_s19, 2  ;;  %v1021_v37 = vmov 0   ;;  %vm449_vm2 = vcmask 1040384  }
  0x2f   : > { %v1148_v1 = vld [vmem:[%s1138_s14 + $0xf8] sm:$0xff]  ;;  %339 = vmatpush.xpose.msra.mxu0 %v1145_v0  ;;  %v1164_v5 = vld [vmem:[%s1138_s14 + $0xf0] sm:$0xff]  ;;  %v1177_v8 = vld [vmem:[%s1138_s14 + $0x68] sm:$0xff]  ;;  %p259_p6 = scmp.lt.s32.totalorder %s1221_s26, 15  ;;  %872 = vset.pattern.permute.xlu1 %v1021_v37  ;;  %s803_s23 = sshll.u32 %s1134_s7, 2 }
  0x30   : > { %v1151_v2 = vld [vmem:[%s1138_s14 + $0x178] sm:$0xff]  ;;  %359 = vmatpush.xpose.msra.mxu1 %v1148_v1  ;;  %v1167_v6 = vld [vmem:[%s1138_s14 + $0x170] sm:$0xff]  ;;  %v1180_v9 = vld [vmem:[%s1138_s14 + $0xe8] sm:$0xff]  ;;  %871 = vset.pattern.permute.xlu0 %v1021_v37  ;;  %s1502_s25 = scalar_lea.vmem [#allocation6], %s803_s23  ;;  %s666_s29 = scalar_lea.hbm %s1573_s4, %s1221_s26 }
  0x31   : > { %v1156_v3 = vld [vmem:[%s1138_s14 + $0x1f8] sm:$0xff]  ;;  %379 = vmatpush.xpose.msra.mxu2 %v1151_v2  ;;  %v1170_v7 = vld [vmem:[%s1138_s14 + $0x1f0] sm:$0xff]  ;;  %v1183_v10 = vld [vmem:[%s1138_s14 + $0x168] sm:$0xff]  ;;  %s1257_s19 = scalar_select %p259_p6, %s1221_s26, 15 }
  0x32   : > { %399 = vmatpush.xpose.msra.mxu3 %v1156_v3  ;;  %v1186_v11 = vld [vmem:[%s1138_s14 + $0x1e8] sm:$0xff]  ;;  %v1193_v12 = vld [vmem:[%s1138_s14 + $0x60] sm:$0xff]  ;;  %v1209_v16 = vld [vmem:[%s1138_s14 + $0x58] sm:$0xff]  ;;  %s1512_s6 = sshll.u32 %s666_s29, 4  ;;  %s667_s8 = sshll.u32 %s1502_s25, 4  ;;  %s670_s6 = int_to_ptr.hbm [resolvable:$true] %s1512_s6  ;;  %s668_s8 = int_to_ptr.vmem [resolvable:$true] %s667_s8 }
  0x33   : > { %340 = vmatpush.xpose.msra.mxu0 %v1161_v4  ;;  %v1196_v13 = vld [vmem:[%s1138_s14 + $0xe0] sm:$0xff]  ;;  %v1212_v17 = vld [vmem:[%s1138_s14 + $0xd8] sm:$0xff]  ;;  %v1228_v20 = vld [vmem:[%s1138_s14 + $0x50] sm:$0xff]  ;;  %s1279_s12 = scalar_lea.vmem %s1569_s0, %s1257_s19  ;;  %s266_s22 = scalar_lea.vmem %s1570_s1, %s1257_s19 }
  0x34   : > { %360 = vmatpush.xpose.msra.mxu1 %v1164_v5  ;;  %v1199_v14 = vld [vmem:[%s1138_s14 + $0x160] sm:$0xff]  ;;  %v1215_v18 = vld [vmem:[%s1138_s14 + $0x158] sm:$0xff]  ;;  %v1231_v21 = vld [vmem:[%s1138_s14 + $0xd0] sm:$0xff]  ;;  %s640_s10 = scalar_lea.sflag [#allocation7], %s1134_s7 }
  0x35   : > { %380 = vmatpush.xpose.msra.mxu2 %v1167_v6  ;;  %v1202_v15 = vld [vmem:[%s1138_s14 + $0x1e0] sm:$0xff]  ;;  %v1218_v19 = vld [vmem:[%s1138_s14 + $0x1d8] sm:$0xff]  ;;  %v1234_v22 = vld [vmem:[%s1138_s14 + $0x150] sm:$0xff] }
  0x36   : > { %400 = vmatpush.xpose.msra.mxu3 %v1170_v7  ;;  %v1237_v23 = vld [vmem:[%s1138_s14 + $0x1d0] sm:$0xff]  ;;  %v1245_v24 = vld [vmem:[%s1138_s14 + $0x48] sm:$0xff]  ;;  %v1264_v28 = vld [vmem:[%s1138_s14 + $0x40] sm:$0xff] }
  0x37   : > { %341 = vmatpush.xpose.msra.mxu0 %v1177_v8  ;;  %v1248_v25 = vld [vmem:[%s1138_s14 + $0xc8] sm:$0xff]  ;;  %v1267_v29 = vld [vmem:[%s1138_s14 + $0xc0] sm:$0xff]  ;;  %v1286_v32 = vld [vmem:[%s1138_s14 + $0x38] sm:$0xff] }
  0x38   : > { %361 = vmatpush.xpose.msra.mxu1 %v1180_v9  ;;  %v1251_v26 = vld [vmem:[%s1138_s14 + $0x148] sm:$0xff]  ;;  %v1270_v30 = vld [vmem:[%s1138_s14 + $0x140] sm:$0xff]  ;;  %v1289_v33 = vld [vmem:[%s1138_s14 + $0xb8] sm:$0xff] }
  0x39   : > { %381 = vmatpush.xpose.msra.mxu2 %v1183_v10  ;;  %v1254_v27 = vld [vmem:[%s1138_s14 + $0x1c8] sm:$0xff]  ;;  %v1273_v31 = vld [vmem:[%s1138_s14 + $0x1c0] sm:$0xff]  ;;  %v1293_v35 = vld [vmem:[%s1138_s14 + $0x138] sm:$0xff] }
  0x3a   : > { %401 = vmatpush.xpose.msra.mxu3 %v1186_v11  ;;  %v419_v34 = vld [vmem:[%s1279_s12] sm:$0x1]  ;;  %v1296_v36 = vld [vmem:[%s1138_s14 + $0x1b8] sm:$0xff]  ;;  %v421_v38 = vld [vmem:[%s1279_s12 + $0x2] sm:$0x1] }
  0x3b   : > { %342 = vmatpush.xpose.msra.mxu0 %v1193_v12  ;;  %426 = vperm.xlu1 %872, %v419_v34   ;;  %v1304_v39 = vld [vmem:[%s1138_s14 + $0x30] sm:$0xff]  ;;  %v420_v43 = vld [vmem:[%s1279_s12 + $0x1] sm:$0x1]  ;;  %v1321_v44 = vld [vmem:[%s1138_s14 + $0x28] sm:$0xff] }
  0x3c   : > { %362 = vmatpush.xpose.msra.mxu1 %v1196_v13  ;;  %v1307_v40 = vld [vmem:[%s1138_s14 + $0xb0] sm:$0xff]  ;;  %434 = vperm.xlu0 %871, %v421_v38   ;;  %v1324_v45 = vld [vmem:[%s1138_s14 + $0xa8] sm:$0xff]  ;;  %v422_v48 = vld [vmem:[%s1279_s12 + $0x3] sm:$0x1]  ;;  %s939_s12 = scalar_lea.hbm %s1573_s4, 16 }
  0x3d   : > { %382 = vmatpush.xpose.msra.mxu2 %v1199_v14  ;;  %v1310_v41 = vld [vmem:[%s1138_s14 + $0x130] sm:$0xff]  ;;  %v1327_v46 = vld [vmem:[%s1138_s14 + $0x128] sm:$0xff]  ;;  %v1338_v49 = vld [vmem:[%s1138_s14 + $0x20] sm:$0xff] }
  0x3e   : > { %402 = vmatpush.xpose.msra.mxu3 %v1202_v15  ;;  %v1313_v42 = vld [vmem:[%s1138_s14 + $0x1b0] sm:$0xff]  ;;  %v1330_v47 = vld [vmem:[%s1138_s14 + $0x1a8] sm:$0xff]  ;;  %v1341_v50 = vld [vmem:[%s1138_s14 + $0xa0] sm:$0xff] }
  0x3f   : > { %343 = vmatpush.xpose.msra.mxu0 %v1209_v16  ;;  %v1344_v51 = vld [vmem:[%s1138_s14 + $0x120] sm:$0xff]  ;;  %v1354_v53 = vld [vmem:[%s1138_s14 + $0x18] sm:$0xff]  ;;  %v1370_v57 = vld [vmem:[%s1138_s14 + $0x10] sm:$0xff] }
  0x40   : > { %363 = vmatpush.xpose.msra.mxu1 %v1212_v17  ;;  %v1347_v52 = vld [vmem:[%s1138_s14 + $0x1a0] sm:$0xff]  ;;  %v1357_v54 = vld [vmem:[%s1138_s14 + $0x98] sm:$0xff]  ;;  %v1373_v58 = vld [vmem:[%s1138_s14 + $0x90] sm:$0xff] }
  0x41   : > { %383 = vmatpush.xpose.msra.mxu2 %v1215_v18  ;;  %v1360_v55 = vld [vmem:[%s1138_s14 + $0x118] sm:$0xff]  ;;  %1583 = vst [vmem:[#allocation11_spill] sm:$0xff] %v1373_v58  ;;  %v1376_v59 = vld [vmem:[%s1138_s14 + $0x110] sm:$0xff]  ;;  %v1386_v61 = vld [vmem:[%s1138_s14 + $0x8] sm:$0xff] }
  0x42   : > { %403 = vmatpush.xpose.msra.mxu3 %v1218_v19  ;;  %v1363_v56 = vld [vmem:[%s1138_s14 + $0x198] sm:$0xff]  ;;  %v1379_v60 = vld [vmem:[%s1138_s14 + $0x190] sm:$0xff]  ;;  %v1389_v62 = vld [vmem:[%s1138_s14 + $0x88] sm:$0xff] }
  0x43   : > { %344 = vmatpush.xpose.msra.mxu0 %v1228_v20  ;;  %430 = vperm.xlu1 %872, %v420_v43   ;;  %1584 = vst [vmem:[#allocation12_spill] sm:$0xff] %v1379_v60  ;;  %v1392_v63 = vld [vmem:[%s1138_s14 + $0x108] sm:$0xff]  ;;  %v1402_v37 = vld [vmem:[%s1138_s14] sm:$0xff] }
  0x44   : > { %364 = vmatpush.xpose.msra.mxu1 %v1231_v21  ;;  %438 = vperm.xlu0 %871, %v422_v48   ;;  %1585 = vst [vmem:[#allocation13_spill] sm:$0xff] %v1389_v62  ;;  %v1395_v34 = vld [vmem:[%s1138_s14 + $0x188] sm:$0xff]  ;;  %v1405_v38 = vld [vmem:[%s1138_s14 + $0x80] sm:$0xff] }
  0x45   : > { %384 = vmatpush.xpose.msra.mxu2 %v1234_v22  ;;  %1586 = vst [vmem:[#allocation14_spill] sm:$0xff] %v1395_v34  ;;  %v1412_v43 = vld [vmem:[%s1138_s14 + $0x100] sm:$0xff] }
  0x46   : > { %404 = vmatpush.xpose.msra.mxu3 %v1237_v23  ;;  %v1415_v48 = vld [vmem:[%s1138_s14 + $0x180] sm:$0xff]  ;;  %s933_s14 = sshra.s32 %s670_s6, 4  ;;  %s934_s14 = int_to_ptr.hbm [resolvable:$true] %s933_s14 }
  0x47   : > { %345 = vmatpush.xpose.msra.mxu0 %v1245_v24  ;;  %s935_s19 = scalar_lea.hbm %s934_s14, 4  ;;  %p940_p2 = scmp.lt.s32.totalorder %s934_s14, %s1573_s4 }
  0x48   : > { %365 = vmatpush.xpose.msra.mxu1 %v1248_v25  ;;  %p936_p12 = scmp.ne.s32.totalorder %s934_s14, %s935_s19  ;;  %p941_p3 = scmp.lt.s32.totalorder %s939_s12, %s935_s19 }
  0x49   : > { %385 = vmatpush.xpose.msra.mxu2 %v1251_v26 }
  0x4a   : > { %405 = vmatpush.xpose.msra.mxu3 %v1254_v27  ;;  %p937_p13 = pnand %p936_p12, %p1098_p10  ;;  %p942_p4 = por %p941_p3, %p940_p2 }
  0x4b   : > { %346 = vmatpush.xpose.msra.mxu0 %v1264_v28 }
  0x4c   : > { %366 = vmatpush.xpose.msra.mxu1 %v1267_v29  ;;  %p938_p0 = pneg %p937_p13 }
  0x4d   : > { %386 = vmatpush.xpose.msra.mxu2 %v1270_v30 }
  0x4e   : > { %406 = vmatpush.xpose.msra.mxu3 %v1273_v31  ;;  %p943_p5 = pnand %p942_p4, %p938_p0 }
  0x4f   : > { %347 = vmatpush.xpose.msra.mxu0 %v1286_v32 }
  0x50   : > { %367 = vmatpush.xpose.msra.mxu1 %v1289_v33 }
  0x51   : > { %387 = vmatpush.xpose.msra.mxu2 %v1293_v35 }
  0x52   : > { %407 = vmatpush.xpose.msra.mxu3 %v1296_v36 }
  0x53   : > { %348 = vmatpush.xpose.msra.mxu0 %v1304_v39 }
  0x54   : > { %368 = vmatpush.xpose.msra.mxu1 %v1307_v40 }
  0x55   : > { %388 = vmatpush.xpose.msra.mxu2 %v1310_v41 }
  0x56   : > { %408 = vmatpush.xpose.msra.mxu3 %v1313_v42 }
  0x57   : > { %349 = vmatpush.xpose.msra.mxu0 %v1321_v44 }
  0x58   : > { %369 = vmatpush.xpose.msra.mxu1 %v1324_v45 }
  0x59   : > { %389 = vmatpush.xpose.msra.mxu2 %v1327_v46 }
  0x5a   : > { %409 = vmatpush.xpose.msra.mxu3 %v1330_v47 }
  0x5b   : > { %350 = vmatpush.xpose.msra.mxu0 %v1338_v49 }
  0x5c   : > { %370 = vmatpush.xpose.msra.mxu1 %v1341_v50 }
  0x5d   : > { %390 = vmatpush.xpose.msra.mxu2 %v1344_v51 }
  0x5e   : > { %410 = vmatpush.xpose.msra.mxu3 %v1347_v52 }
  0x5f   : > { %351 = vmatpush.xpose.msra.mxu0 %v1354_v53 }
  0x60   : > { %371 = vmatpush.xpose.msra.mxu1 %v1357_v54 }
  0x61   : > { %391 = vmatpush.xpose.msra.mxu2 %v1360_v55 }
  0x62   : > { %411 = vmatpush.xpose.msra.mxu3 %v1363_v56 }
  0x63   : > { %352 = vmatpush.xpose.msra.mxu0 %v1370_v57 }
  0x64   : > { %372 = vmatpush.xpose.msra.mxu1 %v1373_v58  ;;  %v272_v58 = vld [vmem:[%s266_s22 + $0x1] sm:$0x1] }
  0x65   : > { %392 = vmatpush.xpose.msra.mxu2 %v1376_v59 }
  0x66   : > { %412 = vmatpush.xpose.msra.mxu3 %v1379_v60  ;;  %v274_v60 = vld [vmem:[%s266_s22 + $0x3] sm:$0x1] }
  0x67   : > { %353 = vmatpush.xpose.msra.mxu0 %v1386_v61 }
  0x68   : > { %373 = vmatpush.xpose.msra.mxu1 %v1389_v62  ;;  %v271_v62 = vld [vmem:[%s266_s22] sm:$0x1] }
  0x69   : > { %393 = vmatpush.xpose.msra.mxu2 %v1392_v63 }
  0x6a   : > { %413 = vmatpush.xpose.msra.mxu3 %v1395_v34  ;;  %v273_v34 = vld [vmem:[%s266_s22 + $0x2] sm:$0x1] }
  0x6b   : > { %354 = vmatpush.xpose.msra.mxu0 %v1402_v37 }
  0x6c   : > { %374 = vmatpush.xpose.msra.mxu1 %v1405_v38 }
  0x6d   : > { %394 = vmatpush.xpose.msra.mxu2 %v1412_v43 }
  0x6e   : > { %414 = vmatpush.xpose.msra.mxu3 %v1415_v48  ;;  %355 = vmatmul.f32.vlgmr.msra.gmra.mxu0 %v271_v62 }
  0x6f   : > { %550 = vmatpush.msrb.mxu0 %v1145_v0  ;;  %375 = vmatmul.f32.vlgmr.msra.gmra.mxu1 %v272_v58  ;;  %v1587_v0 = vld [vmem:[#allocation12_spill] sm:$0xff] }
  0x70   : > { %395 = vmatmul.f32.vlgmr.msra.gmra.mxu2 %v273_v34  ;;  %570 = vmatpush.msrb.mxu1 %v1148_v1  ;;  %v1588_v1 = vld [vmem:[#allocation11_spill] sm:$0xff] }
  0x71   : > { %590 = vmatpush.msrb.mxu2 %v1151_v2  ;;  %415 = vmatmul.f32.vlgmr.msra.gmra.mxu3 %v274_v60  ;;  %v1589_v2 = vld [vmem:[#allocation14_spill] sm:$0xff] }
  0x72   : > { %551 = vmatpush.msrb.mxu0 %v1161_v4  ;;  %610 = vmatpush.msrb.mxu3 %v1156_v3  ;;  %v1590_v3 = vld [vmem:[#allocation13_spill] sm:$0xff] }
  0x73   : > { %591 = vmatpush.msrb.mxu2 %v1167_v6  ;;  %571 = vmatpush.msrb.mxu1 %v1164_v5  ;;  %v423_v5 = vlaneseq }
  0x74   : > { %552 = vmatpush.msrb.mxu0 %v1177_v8  ;;  %611 = vmatpush.msrb.mxu3 %v1170_v7 }
  0x75   : > { %592 = vmatpush.msrb.mxu2 %v1183_v10  ;;  %572 = vmatpush.msrb.mxu1 %v1180_v9  ;;  %v424_v10 = vand.u32 127, %v423_v5 }
  0x76   : > { %553 = vmatpush.msrb.mxu0 %v1193_v12  ;;  %612 = vmatpush.msrb.mxu3 %v1186_v11 }
  0x77   : > { %593 = vmatpush.msrb.mxu2 %v1199_v14  ;;  %573 = vmatpush.msrb.mxu1 %v1196_v13 }
  0x78   : > { %554 = vmatpush.msrb.mxu0 %v1209_v16  ;;  %613 = vmatpush.msrb.mxu3 %v1202_v15 }
  0x79   : > { %594 = vmatpush.msrb.mxu2 %v1215_v18  ;;  %574 = vmatpush.msrb.mxu1 %v1212_v17 }
  0x7a   : > { %555 = vmatpush.msrb.mxu0 %v1228_v20  ;;  %614 = vmatpush.msrb.mxu3 %v1218_v19 }
  0x7b   : > { %595 = vmatpush.msrb.mxu2 %v1234_v22  ;;  %575 = vmatpush.msrb.mxu1 %v1231_v21 }
  0x7c   : > { %556 = vmatpush.msrb.mxu0 %v1245_v24  ;;  %615 = vmatpush.msrb.mxu3 %v1237_v23 }
  0x7d   : > { %596 = vmatpush.msrb.mxu2 %v1251_v26  ;;  %576 = vmatpush.msrb.mxu1 %v1248_v25 }
  0x7e   : > { %557 = vmatpush.msrb.mxu0 %v1264_v28  ;;  %616 = vmatpush.msrb.mxu3 %v1254_v27 }
  0x7f   : > { %597 = vmatpush.msrb.mxu2 %v1270_v30  ;;  %577 = vmatpush.msrb.mxu1 %v1267_v29 }
  0x80   : > { %558 = vmatpush.msrb.mxu0 %v1286_v32  ;;  %617 = vmatpush.msrb.mxu3 %v1273_v31 }
  0x81   : > { %598 = vmatpush.msrb.mxu2 %v1293_v35  ;;  %578 = vmatpush.msrb.mxu1 %v1289_v33 }
  0x82   : > { %559 = vmatpush.msrb.mxu0 %v1304_v39  ;;  %618 = vmatpush.msrb.mxu3 %v1296_v36 }
  0x83   : > { %599 = vmatpush.msrb.mxu2 %v1310_v41  ;;  %579 = vmatpush.msrb.mxu1 %v1307_v40 }
  0x84   : > { %560 = vmatpush.msrb.mxu0 %v1321_v44  ;;  %619 = vmatpush.msrb.mxu3 %v1313_v42 }
  0x85   : > { %600 = vmatpush.msrb.mxu2 %v1327_v46  ;;  %580 = vmatpush.msrb.mxu1 %v1324_v45 }
  0x86   : > { %561 = vmatpush.msrb.mxu0 %v1338_v49  ;;  %620 = vmatpush.msrb.mxu3 %v1330_v47 }
  0x87   : > { %601 = vmatpush.msrb.mxu2 %v1344_v51  ;;  %581 = vmatpush.msrb.mxu1 %v1341_v50 }
  0x88   : > { %562 = vmatpush.msrb.mxu0 %v1354_v53  ;;  %621 = vmatpush.msrb.mxu3 %v1347_v52 }
  0x89   : > { %602 = vmatpush.msrb.mxu2 %v1360_v55  ;;  %582 = vmatpush.msrb.mxu1 %v1357_v54 }
  0x8a   : > { %563 = vmatpush.msrb.mxu0 %v1370_v57  ;;  %622 = vmatpush.msrb.mxu3 %v1363_v56 }
  0x8b   : > { %603 = vmatpush.msrb.mxu2 %v1376_v59  ;;  %583 = vmatpush.msrb.mxu1 %v1588_v1 }
  0x8c   : > { %564 = vmatpush.msrb.mxu0 %v1386_v61  ;;  %623 = vmatpush.msrb.mxu3 %v1587_v0 }
  0x8d   : > { %604 = vmatpush.msrb.mxu2 %v1392_v63  ;;  %584 = vmatpush.msrb.mxu1 %v1590_v3 }
  0x8e   : > { %565 = vmatpush.msrb.mxu0 %v1402_v37  ;;  %624 = vmatpush.msrb.mxu3 %v1589_v2 }
  0x8f   : > { %605 = vmatpush.msrb.mxu2 %v1412_v43  ;;  %585 = vmatpush.msrb.mxu1 %v1405_v38 }
  0x90   : > { %625 = vmatpush.msrb.mxu3 %v1415_v48 }
  0xad   : > { %v427_v4 = vpop.permute.xlu1 %426 }
  0xae   : > { %v428_v7 = vperm.slane %v427_v4, 0  ;;  %v435_v8 = vpop.permute.xlu0 %434 }
  0xaf   : > { %v436_v13 = vperm.slane %v435_v8, 0 }
  0xb0   : > { %vm441_vm0 = vcmp.ge.s32.totalorder %v424_v10, %v428_v7 }
  0xb1   : > { %vm443_vm3 = vcmp.ge.s32.totalorder %v424_v10, %v436_v13 }
  0xb5   : > { %v431_v6 = vpop.permute.xlu1 %430 }
  0xb6   : > { %v432_v9 = vperm.slane %v431_v6, 0  ;;  %v439_v18 = vpop.permute.xlu0 %438 }
  0xb7   : > { %v440_v19 = vperm.slane %v439_v18, 0 }
  0xb8   : > { %vm442_vm1 = vcmp.ge.s32.totalorder %v424_v10, %v432_v9 }
  0xb9   : > { %vm444_vm4 = vcmp.ge.s32.totalorder %v424_v10, %v440_v19 }
  0xeb   : > { %v356_v11 = vpop.f32.mrf.mxu0 }
  0xec   : > { %v376_v12 = vpop.f32.mrf.mxu1  ;;  %v445_v14 = vsel %vm441_vm0, -1e+30, %v356_v11 }
  0xed   : > { %v446_v15 = vsel %vm442_vm1, -1e+30, %v376_v12  ;;  %v450_v17 = vsel %vm449_vm2, %v445_v14, -inf }
  0xee   : > { %v453_v16 = vsel %vm449_vm2, %v446_v15, -inf  ;;  %451 = vmax.xlane.f32.xlu0 %v450_v17 }
  0xef   : > { %454 = vmax.xlane.f32.xlu1 %v453_v16 }
  0xf3   : > { %v396_v20 = vpop.f32.mrf.mxu2 }
  0xf4   : > { %v447_v21 = vsel %vm443_vm3, -1e+30, %v396_v20  ;;  %v416_v23 = vpop.f32.mrf.mxu3 }
  0xf5   : > { %v456_v22 = vsel %vm449_vm2, %v447_v21, -inf  ;;  %v448_v24 = vsel %vm444_vm4, -1e+30, %v416_v23 }
  0xf6   : > { %457 = vmax.xlane.f32.xlu2 %v456_v22  ;;  %v459_v25 = vsel %vm449_vm2, %v448_v24, -inf }
  0xfe   : > { %460 = vmax.xlane.f32.xlu2 %v459_v25 }
 0x161   : > { %v452_v26 = vpop.xlane.xlu0 %451 }
 0x162   : > { %v462_v27 = vsub.f32 %v445_v14, %v452_v26  ;;  %v455_v39 = vpop.xlane.xlu1 %454 }
 0x163   : > { %v463_v42 = vsub.f32 %v446_v15, %v455_v39 }
 0x164   : > { %v466_v28 = vmul.f32 1.442695, %v462_v27 }
 0x165   : > { %v468_v45 = vmul.f32 1.442695, %v463_v42 }
 0x166   : > { %873 = vpow2.f32 %v466_v28 }
 0x169   : > { %v458_v29 = vpop.xlane.xlu2 %457 }
 0x16a   : > { %v464_v30 = vsub.f32 %v447_v21, %v458_v29 }
 0x16c   : > { %v470_v31 = vmul.f32 1.442695, %v464_v30  ;;  %v874_v32 = vpop.eup %873 }
 0x16d   : > { %v474_v33 = vsel %vm449_vm2, %v874_v32, 0.0 }
 0x16e   : > { %875 = vpow2.f32 %v470_v31  ;;  %475 = vadd.xlane.f32.xlu2 %v474_v33 }
 0x171   : > { %v461_v35 = vpop.xlane.xlu2 %460 }
 0x172   : > { %v465_v36 = vsub.f32 %v448_v24, %v461_v35 }
 0x174   : > { %v876_v40 = vpop.eup %875  ;;  %v472_v41 = vmul.f32 1.442695, %v465_v36 }
 0x175   : > { %v480_v44 = vsel %vm449_vm2, %v876_v40, 0.0 }
 0x176   : > { %877 = vpow2.f32 %v472_v41  ;;  %481 = vadd.xlane.f32.xlu2 %v480_v44 }
 0x177   : > { %879 = vpow2.f32 %v468_v45 }
 0x17c   : > { %v1491_v46 = vpop.eup %877 }
 0x17d   : > { %v483_v47 = vsel %vm449_vm2, %v1491_v46, 0.0  ;;  %v1495_v49 = vpop.eup %879 }
 0x17e   : > { %484 = vadd.xlane.f32.xlu2 %v483_v47  ;;  %v477_v50 = vsel %vm449_vm2, %v1495_v49, 0.0 }
 0x186   : > { %478 = vadd.xlane.f32.xlu2 %v477_v50 }
 0x1e1   : > { %v476_v51 = vpop.xlane.xlu2 %475 }
 0x1e2   : > { %881 = vrcp.f32 %v476_v51  ;;  %v497_v56 = vand.u32 2147483648, %v476_v51  ;;  %v495_v58 = vand.u32 2147483647, %v476_v51  ;;  %vm491_vm6 = vweird.f32 %v476_v51 }
 0x1e4   : > { %v498_v61 = vor.u32 1.1754944e-38, %v497_v56  ;;  %vm496_vm8 = vcmp.eq.f32.partialorder %v495_v58, 8.507059e+37 }
 0x1e8   : > { %v882_v52 = vpop.eup %881 }
 0x1e9   : > { %v487_v53 = vmul.f32 %v882_v52, %v476_v51  ;;  %v482_v54 = vpop.xlane.xlu2 %481  ;;  %vm492_vm5 = vweird.f32 %v882_v52 }
 0x1ea   : > { %883 = vrcp.f32 %v482_v54  ;;  %vm493_vm7 = vmor %vm491_vm6, %vm492_vm5  ;;  %v527_v0 = vand.u32 2147483648, %v482_v54  ;;  %v525_v1 = vand.u32 2147483647, %v482_v54  ;;  %vm521_vm10 = vweird.f32 %v482_v54 }
 0x1eb   : > { %v488_v55 = vsub.f32 1.0, %v487_v53 }
 0x1ec   : > { %v528_v4 = vor.u32 1.1754944e-38, %v527_v0  ;;  %vm526_vm12 = vcmp.eq.f32.partialorder %v525_v1, 8.507059e+37 }
 0x1ed   : > { %v489_v57 = vmul.f32 %v882_v52, %v488_v55 }
 0x1ef   : > { %v490_v59 = vadd.f32 %v882_v52, %v489_v57 }
 0x1f0   : > { %v884_v60 = vpop.eup %883 }
 0x1f1   : > { %v517_v62 = vmul.f32 %v884_v60, %v482_v54  ;;  %v485_v63 = vpop.xlane.xlu2 %484  ;;  %v494_v34 = vsel %vm493_vm7, %v882_v52, %v490_v59  ;;  %vm522_vm9 = vweird.f32 %v884_v60 }
 0x1f2   : > { %885 = vrcp.f32 %v485_v63  ;;  %v499_v37 = vsel %vm496_vm8, %v498_v61, %v494_v34  ;;  %vm523_vm11 = vmor %vm521_vm10, %vm522_vm9  ;;  %v542_v10 = vand.u32 2147483648, %v485_v63  ;;  %v540_v13 = vand.u32 2147483647, %v485_v63 }
 0x1f3   : > { %v518_v38 = vsub.f32 1.0, %v517_v62  ;;  %v500_v43 = vmul.f32 %v874_v32, %v499_v37  ;;  %vm536_vm14 = vweird.f32 %v485_v63 }
 0x1f4   : > { %v543_v16 = vor.u32 1.1754944e-38, %v542_v10  ;;  %vm541_vm0 = vcmp.eq.f32.partialorder %v540_v13, 8.507059e+37 }
 0x1f5   : > { %v519_v48 = vmul.f32 %v884_v60, %v518_v38  ;;  %546 = vst [vmem:[%s1502_s25] sm:$0x1] %v500_v43  ;;  %566 = vmatmul.f32.vlgmr.msrb.gmra.mxu0 %v500_v43 }
 0x1f7   : > { %v520_v2 = vadd.f32 %v884_v60, %v519_v48 }
 0x1f8   : > { %v886_v3 = vpop.eup %885 }
 0x1f9   : > { %v532_v5 = vmul.f32 %v886_v3, %v485_v63  ;;  %v479_v6 = vpop.xlane.xlu2 %478  ;;  %v524_v7 = vsel %vm523_vm11, %v884_v60, %v520_v2  ;;  %vm537_vm13 = vweird.f32 %v886_v3 }
 0x1fa   : > { %887 = vrcp.f32 %v479_v6  ;;  %v529_v9 = vsel %vm526_vm12, %v528_v4, %v524_v7  ;;  %vm538_vm15 = vmor %vm536_vm14, %vm537_vm13  ;;  %v512_v22 = vand.u32 2147483648, %v479_v6  ;;  %v510_v24 = vand.u32 2147483647, %v479_v6 }
 0x1fb   : > { %v533_v8 = vsub.f32 1.0, %v532_v5  ;;  %v530_v11 = vmul.f32 %v876_v40, %v529_v9  ;;  %vm506_vm2 = vweird.f32 %v479_v6 }
 0x1fc   : > { %v513_v26 = vor.u32 1.1754944e-38, %v512_v22  ;;  %vm511_vm4 = vcmp.eq.f32.partialorder %v510_v24, 8.507059e+37 }
 0x1fd   : > { %v534_v12 = vmul.f32 %v886_v3, %v533_v8  ;;  %548 = vst [vmem:[%s1502_s25 + $0x2] sm:$0x1] %v530_v11  ;;  %606 = vmatmul.f32.vlgmr.msrb.gmra.mxu2 %v530_v11 }
 0x1ff   : > { %v535_v14 = vadd.f32 %v886_v3, %v534_v12 }
 0x200   : > { %v888_v15 = vpop.eup %887 }
 0x201   : > { %v502_v17 = vmul.f32 %v888_v15, %v479_v6  ;;  %v539_v18 = vsel %vm538_vm15, %v886_v3, %v535_v14  ;;  %vm507_vm1 = vweird.f32 %v888_v15 }
 0x202   : > { %v544_v19 = vsel %vm541_vm0, %v543_v16, %v539_v18  ;;  %vm508_vm3 = vmor %vm506_vm2, %vm507_vm1 }
 0x203   : > { %v503_v20 = vsub.f32 1.0, %v502_v17  ;;  %v545_v21 = vmul.f32 %v1491_v46, %v544_v19 }
 0x205   : > { %v504_v23 = vmul.f32 %v888_v15, %v503_v20  ;;  %549 = vst [vmem:[%s1502_s25 + $0x3] sm:$0x1] %v545_v21  ;;  %626 = vmatmul.f32.vlgmr.msrb.gmra.mxu3 %v545_v21 }
 0x207   : > { %v505_v25 = vadd.f32 %v888_v15, %v504_v23 }
 0x209   : > { %v509_v27 = vsel %vm508_vm3, %v888_v15, %v505_v25 }
 0x20a   : > { %v514_v28 = vsel %vm511_vm4, %v513_v26, %v509_v27 }
 0x20b   : > { %v515_v29 = vmul.f32 %v1495_v49, %v514_v28 }
 0x20d   : > { %547 = vst [vmem:[%s1502_s25 + $0x1] sm:$0x1] %v515_v29  ;;  %586 = vmatmul.f32.vlgmr.msrb.gmra.mxu1 %v515_v29 }
 0x20e   : > { %946 = shalt.err (!%p943_p5)
}
 0x20f   : > { %s1022_s22 = smov 16   ;;  %s1023_s25 = smov 1  }
 0x210   : > { %818 = dma.vmem_to_hbm [thread:$0]  (%p1098_p10), %s668_s8, 64, %s670_s6, %s640_s10, %s1022_s22, %s1022_s22, %s1023_s25  }
 0x211   : > { %s250_s30 = scalar_lea.vmem [#allocation5], %s803_s23  ;;  %s650_s14 = scalar_lea.hbm %s1572_s3, %s1221_s26 }
 0x212   : > { %s653_s19 = sshll.u32 %s650_s14, 4  ;;  %s651_s9 = sshll.u32 %s250_s30, 4  ;;  %s654_s19 = int_to_ptr.hbm [resolvable:$true] %s653_s19  ;;  %s652_s9 = int_to_ptr.vmem [resolvable:$true] %s651_s9 }
 0x213   : > { %s635_s6 = scalar_lea.sflag [#allocation4], %s1134_s7  ;;  %s961_s8 = sshra.s32 %s654_s19, 4  ;;  %s962_s8 = int_to_ptr.hbm [resolvable:$true] %s961_s8 }
 0x214   : > { %s963_s23 = scalar_lea.hbm %s962_s8, 4  ;;  %s967_s26 = scalar_lea.hbm %s1572_s3, 16 }
 0x215   : > { %p964_p7 = scmp.ne.s32.totalorder %s962_s8, %s963_s23  ;;  %p968_p1 = scmp.lt.s32.totalorder %s962_s8, %s1572_s3 }
 0x216   : > { %p969_p6 = scmp.lt.s32.totalorder %s967_s26, %s963_s23 }
 0x217   : > { %p965_p8 = pnand %p964_p7, %p1098_p10 }
 0x218   : > { %p970_p12 = por %p969_p6, %p968_p1 }
 0x219   : > { %p966_p9 = pneg %p965_p8 }
 0x21b   : > { %p971_p13 = pnand %p970_p12, %p966_p9 }
 0x272   : > { %v567_v30 = vpop.f32.mrf.mxu0 }
 0x273   : > { %630 = vst [vmem:[%s250_s30] sm:$0x1] %v567_v30 }
 0x280   : > { %v607_v31 = vpop.f32.mrf.mxu2 }
 0x281   : > { %632 = vst [vmem:[%s250_s30 + $0x2] sm:$0x1] %v607_v31 }
 0x288   : > { %v627_v32 = vpop.f32.mrf.mxu3 }
 0x289   : > { %633 = vst [vmem:[%s250_s30 + $0x3] sm:$0x1] %v627_v32 }
 0x28a   : > { %v587_v33 = vpop.f32.mrf.mxu1 }
 0x28b   : > { %631 = vst [vmem:[%s250_s30 + $0x1] sm:$0x1] %v587_v33 }
 0x28c   : > { %974 = shalt.err (!%p971_p13)
}
 0x28d   : > { %817 = dma.vmem_to_hbm [thread:$0]  (%p1098_p10), %s652_s9, 64, %s654_s19, %s635_s6, %s1022_s22, %s1022_s22, %s1023_s25  }
 0x28e PF: > { %p833_p0 = scmp.ge.s32.totalorder %s1017_s18, 2  ;;  %s684_s7 = sand.u32 1, %s1005_s15  }
 0x28f   : > { %s685_s20 = scalar_lea.sflag [#allocation4], %s684_s7 }
 0x290   : > { %p826_p2 = pnand %p833_p0, %p1102_p11 }
 0x292   : > { %p827_p3 = pneg %p826_p2 }
 0x294   : > { %996 = dma.done.wait (%p827_p3), %s685_s20, 64  }
 0x295   : > { %998 = vsyncadd (%p827_p3), %s685_s20, 4294967232  ;;  %s695_s30 = scalar_lea.sflag [#allocation7], %s684_s7 }
 0x296   : > { %1000 = dma.done.wait (%p827_p3), %s695_s30, 64  }
 0x297   : > { %1002 = vsyncadd (%p827_p3), %s695_s30, 4294967232  ;;  %p21_p10 = scmp.ge.s32.totalorder %s1074_s21, 6   ;;  %s1591_s15 = smov %s1009_s16 }
 0x298   : > { %s1592_s16 = smov %s1013_s17  ;;  %s1593_s17 = smov %s1086_s24 }
 0x299   : > { %s1594_s18 = smov %s1074_s21  ;;  %23 = sbr.rel (!%p21_p10) target bundleno = 7 (0x7), region = 100 }
 0x29e   :  { %701 = vsyncpa [#allocation3], 1 }
 0x29f   :  { %703 = vsyncpa [#allocation3 + $0x1], 1 }
 0x2a0   :  { %704 = vsyncpa [#allocation4], 1 }
 0x2a1   :  { %706 = vsyncpa [#allocation4 + $0x1], 1 }
 0x2a2   :  { %707 = vsyncpa [#allocation7], 1 }
 0x2a3   :  { %709 = vsyncpa [#allocation7 + $0x1], 1 }

</bundles_post_ra>
